<compile_context>
chip_gen: v6e
topology: v6e:2x2x1
jax: 0.10.0
libtpu: 0.0.40
codegen_flags: <defaults>
</compile_context>

<pallas_src>
from functools import lru_cache

import numpy as np
import jax
import jax.numpy as jnp
from jax.experimental import pallas as pl
from jax.experimental.pallas import tpu as pltpu

EPS = 1e-5                       # GroupNorm default eps
CPAD = 128                       # lane width: channel-like dims zero-padded to this
VMEM_LIMIT = 32 * 1024 * 1024    # explicit scoped-VMEM limit (covers v5e..v7x)


def _round_up(n, m):
    return (n + m - 1) // m * m


def _gelu_tanh(x):
    # TODO(synk): PyTorch nn.GELU default is the exact erf form; tanh approximation is
    # used because erf lowering inside Mosaic is not guaranteed (deviation ~1e-3 rel).
    c = jnp.float32(0.7978845608028654)  # sqrt(2/pi)
    return 0.5 * x * (1.0 + jnp.tanh(c * (x + 0.044715 * x * x * x)))


@lru_cache(maxsize=None)
def pool_inv_counts(h, w, pool_size):
    """[H, W, 1] reciprocal window sizes for AvgPool(count_include_pad=False)."""
    pad = pool_size // 2
    ys = np.arange(h)
    rows = np.minimum(ys + pad, h - 1) - np.maximum(ys - pad, 0) + 1
    xs = np.arange(w)
    cols = np.minimum(xs + pad, w - 1) - np.maximum(xs - pad, 0) + 1
    inv = (1.0 / (rows[:, None] * cols[None, :])).astype(np.float32)
    return jnp.asarray(inv.reshape(h, w, 1))


def _choose_token_tile(hw, max_tile=2048):
    if hw <= max_tile:
        return hw
    for t in range(max_tile, 7, -8):
        if hw % t == 0:
            return t
    return hw


# ----------------------------- Pallas kernels ------------------------------ #

def matmul_bias(x_bf, w_bf, b_f32, out_dtype=jnp.bfloat16):
    """[M,K]@[K,N]+[1,N] with M tiled, K/N multiples of 128, bf16 MXU, f32 accum."""
    m, k = x_bf.shape
    n = w_bf.shape[1]
    tile_m = 1024 if k <= 512 else 512        # bigger slabs amortize per-step overhead
    tm = min(tile_m, _round_up(m, 8))
    mp = _round_up(m, tm)
    if mp != m:
        x_bf = jnp.pad(x_bf, ((0, mp - m), (0, 0)))

    def kernel(x_ref, w_ref, b_ref, o_ref):
        o_ref[...] = (jnp.dot(x_ref[...], w_ref[...],
                              preferred_element_type=jnp.float32)
                      + b_ref[...]).astype(o_ref.dtype)

    out = pl.pallas_call(
        kernel,
        out_shape=jax.ShapeDtypeStruct((mp, n), out_dtype),
        grid=(mp // tm,),
        in_specs=[pl.BlockSpec((tm, k), lambda i: (i, 0)),
                  pl.BlockSpec((k, n), lambda i: (0, 0)),
                  pl.BlockSpec((1, n), lambda i: (0, 0))],
        out_specs=pl.BlockSpec((tm, n), lambda i: (i, 0)),
        compiler_params=pltpu.CompilerParams(
            dimension_semantics=("parallel",),
            vmem_limit_bytes=VMEM_LIMIT),
    )(x_bf, w_bf, b_f32)
    return out[:m]


def pool_mixer(feat, inv_counts, blk, pool_size):
    """Token-mixer half of a PoolFormerBlock.

    feat: [B, H, W, CPAD] bf16 ->
      x2            [B, H, W, CPAD] bf16  (x + ls1*(pool(norm1(x)) - norm1(x)))
      scale2/shift2 [B, 1, CPAD]    f32   (GroupNorm2 folded with its affine, per sample)
    """
    b, h, w, c = feat.shape
    c_true = blk["c_true"]
    inv_n = 1.0 / float(h * w * c_true)       # true element count (padded channels are 0)
    pad = pool_size // 2
    hp, wp = h + 2 * pad, w + 2 * pad

    def kernel(x_ref, inv_ref, g1_ref, ls1_ref, g2_ref, b2_ref,
               x2_ref, sc_ref, sh_ref, pbuf):
        x = x_ref[0].astype(jnp.float32)                         # [H, W, C]
        # GroupNorm1 stats in a single pass (sum & sum-of-squares), f32.
        s = jnp.sum(jnp.sum(x, axis=0), keepdims=True)           # (1, 1)
        ss = jnp.sum(jnp.sum(x * x, axis=0), keepdims=True)
        m = s * inv_n
        var = jnp.maximum(ss * inv_n - m * m, 0.0)               # clamp tiny negatives
        r = jax.lax.rsqrt(var + EPS)

        # 3x3 window sum: zero the halo border (cheap, small stores), write x into the
        # centre of the padded scratch once, then accumulate 9 statically-offset slice
        # loads (shift work goes to XLU/sublane path, no full-tile concat temporaries).
        pbuf[0:pad, :, :] = jnp.zeros((pad, wp, c), jnp.float32)
        pbuf[pad + h:hp, :, :] = jnp.zeros((pad, wp, c), jnp.float32)
        pbuf[pad:pad + h, 0:pad, :] = jnp.zeros((h, pad, c), jnp.float32)
        pbuf[pad:pad + h, pad + w:wp, :] = jnp.zeros((h, pad, c), jnp.float32)
        pbuf[pad:pad + h, pad:pad + w, :] = x

        ps = pbuf[0:h, 0:w, :]
        for di in range(pool_size):
            for dj in range(pool_size):
                if di == 0 and dj == 0:
                    continue
                ps = ps + pbuf[di:di + h, dj:dj + w, :]
        pooled = ps * inv_ref[...]                               # [H,W,C] * [H,W,1]

        # pool(norm1(x)) - norm1(x) == (g1/std) * (pool(x) - x): mean/beta cancel
        # because count_include_pad=False pooling preserves constant fields.
        alpha = ls1_ref[...] * g1_ref[...] * r                   # (1,1,C)
        x2 = x + alpha * (pooled - x)
        x2_ref[0] = x2.astype(x2_ref.dtype)

        # GroupNorm2 stats of the mixer output, folded with gamma2/beta2 so the
        # token-tiled FFN kernel only does a per-channel scale+shift.
        s2 = jnp.sum(jnp.sum(x2, axis=0), keepdims=True)
        ss2 = jnp.sum(jnp.sum(x2 * x2, axis=0), keepdims=True)
        m2 = s2 * inv_n
        var2 = jnp.maximum(ss2 * inv_n - m2 * m2, 0.0)
        r2 = jax.lax.rsqrt(var2 + EPS)
        sc_ref[0] = g2_ref[0] * r2
        sh_ref[0] = b2_ref[0] - m2 * r2 * g2_ref[0]

    out_shapes = (jax.ShapeDtypeStruct((b, h, w, c), jnp.bfloat16),
                  jax.ShapeDtypeStruct((b, 1, c), jnp.float32),
                  jax.ShapeDtypeStruct((b, 1, c), jnp.float32))
    in_specs = [
        pl.BlockSpec((1, h, w, c), lambda i: (i, 0, 0, 0)),
        pl.BlockSpec((h, w, 1), lambda i: (0, 0, 0)),
        pl.BlockSpec((1, 1, c), lambda i: (0, 0, 0)),   # g1
        pl.BlockSpec((1, 1, c), lambda i: (0, 0, 0)),   # ls1
        pl.BlockSpec((1, 1, c), lambda i: (0, 0, 0)),   # g2
        pl.BlockSpec((1, 1, c), lambda i: (0, 0, 0)),   # b2
    ]
    out_specs = (
        pl.BlockSpec((1, h, w, c), lambda i: (i, 0, 0, 0)),
        pl.BlockSpec((1, 1, c), lambda i: (i, 0, 0)),
        pl.BlockSpec((1, 1, c), lambda i: (i, 0, 0)),
    )
    return pl.pallas_call(
        kernel,
        out_shape=out_shapes,
        grid=(b,),
        in_specs=in_specs,
        out_specs=out_specs,
        scratch_shapes=[pltpu.VMEM((hp, wp, c), jnp.float32)],
        compiler_params=pltpu.CompilerParams(
            dimension_semantics=("parallel",),
            vmem_limit_bytes=VMEM_LIMIT),
    )(feat, inv_counts, blk["g1"], blk["ls1"], blk["g2"], blk["b2"])


def ffn_block(x_tok, sc, sh, blk):
    """FFN half of a PoolFormerBlock, tiled over (batch, token tiles).

    x_tok: [B, HW, CPAD] bf16; sc/sh: [B, 1, CPAD] f32 folded GroupNorm2 scale/shift.
    """
    b, hw, c = x_tok.shape
    hd = blk["w1"].shape[1]
    t = _choose_token_tile(hw)
    hw_p = _round_up(hw, t)
    x_in = jnp.pad(x_tok, ((0, 0), (0, hw_p - hw), (0, 0))) if hw_p != hw else x_tok

    def kernel(x_ref, sc_ref, sh_ref, w1_ref, b1_ref, w2_ref, b2_ref, ls2_ref, o_ref):
        x = x_ref[0].astype(jnp.float32)                         # [T, C]
        xn = x * sc_ref[0] + sh_ref[0]                           # folded GroupNorm2
        h1 = jnp.dot(xn.astype(jnp.bfloat16), w1_ref[...],
                     preferred_element_type=jnp.float32) + b1_ref[...]
        h1 = _gelu_tanh(h1)                                      # elementwise kept f32
        y = jnp.dot(h1.astype(jnp.bfloat16), w2_ref[...],
                    preferred_element_type=jnp.float32) + b2_ref[...]
        o_ref[0] = (x + y * ls2_ref[...]).astype(o_ref.dtype)

    # TODO(synk): add pipeline_mode=pl.Buffered(3) on the x spec if an xprof trace
    # shows exposed activation DMA at larger shapes (weights are resident already).
    out = pl.pallas_call(
        kernel,
        out_shape=jax.ShapeDtypeStruct((b, hw_p, c), jnp.bfloat16),
        grid=(b, hw_p // t),
        in_specs=[
            pl.BlockSpec((1, t, c), lambda i, j: (i, j, 0)),
            pl.BlockSpec((1, 1, c), lambda i, j: (i, 0, 0)),
            pl.BlockSpec((1, 1, c), lambda i, j: (i, 0, 0)),
            pl.BlockSpec((c, hd), lambda i, j: (0, 0)),          # w1 (bf16, resident)
            pl.BlockSpec((1, hd), lambda i, j: (0, 0)),
            pl.BlockSpec((hd, c), lambda i, j: (0, 0)),          # w2 (bf16, resident)
            pl.BlockSpec((1, c), lambda i, j: (0, 0)),
            pl.BlockSpec((1, c), lambda i, j: (0, 0)),           # ls2
        ],
        out_specs=pl.BlockSpec((1, t, c), lambda i, j: (i, j, 0)),
        compiler_params=pltpu.CompilerParams(
            dimension_semantics=("parallel", "parallel"),
            vmem_limit_bytes=VMEM_LIMIT),
    )(x_in, sc, sh, blk["w1"], blk["bf1"], blk["w2"], blk["bf2"], blk["ls2"])
    return out[:, :hw] if hw_p != hw else out


def head(feat_tok, pp):
    """Final GroupNorm + global average pool + Linear, gridded over batch."""
    b, hw, c = feat_tok.shape
    c_true = pp["c_last"]
    nc = pp["num_classes"]
    ncp = pp["head_w"].shape[1]
    inv_n = 1.0 / float(hw * c_true)
    inv_hw = 1.0 / float(hw)

    def kernel(x_ref, g_ref, be_ref, w_ref, bias_ref, o_ref):
        x = x_ref[0].astype(jnp.float32)                         # [HW, C]
        s = jnp.sum(jnp.sum(x, axis=0), keepdims=True)           # (1, 1)
        ss = jnp.sum(jnp.sum(x * x, axis=0), keepdims=True)
        m = s * inv_n
        var = jnp.maximum(ss * inv_n - m * m, 0.0)
        r = jax.lax.rsqrt(var + EPS)
        xn = (x - m) * r * g_ref[...] + be_ref[...]
        pooled = jnp.sum(xn, axis=0, keepdims=True) * inv_hw     # [1, C] global avg pool
        o_ref[0] = (jnp.dot(pooled.astype(jnp.bfloat16), w_ref[...],
                            preferred_element_type=jnp.float32)
                    + bias_ref[...]).astype(o_ref.dtype)

    logits = pl.pallas_call(
        kernel,
        out_shape=jax.ShapeDtypeStruct((b, 1, ncp), jnp.float32),
        grid=(b,),
        in_specs=[
            pl.BlockSpec((1, hw, c), lambda i: (i, 0, 0)),
            pl.BlockSpec((1, c), lambda i: (0, 0)),
            pl.BlockSpec((1, c), lambda i: (0, 0)),
            pl.BlockSpec((c, ncp), lambda i: (0, 0)),
            pl.BlockSpec((1, ncp), lambda i: (0, 0)),
        ],
        out_specs=pl.BlockSpec((1, 1, ncp), lambda i: (i, 0, 0)),
        compiler_params=pltpu.CompilerParams(
            dimension_semantics=("parallel",),
            vmem_limit_bytes=VMEM_LIMIT),
    )(feat_tok, pp["norm_g"], pp["norm_b"], pp["head_w"], pp["head_b"])
    return logits[:, 0, :nc]


# ------------------------------ JAX glue code ------------------------------ #

def im2col_nhwc(x, kh, kw, stride, pad, k_pad):
    """x: [B,H,W,C] -> patches [B*Ho*Wo, k_pad], feature order (i, j, c); the zero
    K-padding block is appended inside the single concatenate (no extra HBM pass)."""
    b, h, w, c = x.shape
    xp = jnp.pad(x, ((0, 0), (pad, pad), (pad, pad), (0, 0)))
    ho = (h + 2 * pad - kh) // stride + 1
    wo = (w + 2 * pad - kw) // stride + 1
    cols = []
    for i in range(kh):
        for j in range(kw):
            cols.append(xp[:, i:i + stride * ho:stride, j:j + stride * wo:stride, :])
    extra = k_pad - kh * kw * c
    if extra > 0:
        cols.append(jnp.zeros((b, ho, wo, extra), x.dtype))
    patches = jnp.concatenate(cols, axis=-1)                     # [B,Ho,Wo,k_pad]
    return patches.reshape(b * ho * wo, k_pad), ho, wo


def patch_embed_conv(x_nhwc, wmat_bf, bias, kh, kw, stride, pad):
    """Conv2d as im2col + tiled Pallas matmul (im2col built at the padded K width).
    TODO(synk): fuse im2col into the Pallas matmul (loop kh*kw over shifted NHWC
    slices in-kernel) to remove the k^2 HBM blow-up entirely."""
    b = x_nhwc.shape[0]
    kp = wmat_bf.shape[0]
    patches, ho, wo = im2col_nhwc(x_nhwc, kh, kw, stride, pad, kp)
    y = matmul_bias(patches, wmat_bf, bias)                      # bf16 out
    return y.reshape(b, ho, wo, wmat_bf.shape[1]), ho, wo


def init_params(key, embed_dims, mlp_ratios, num_classes,
                in_patch=7, down_patch=3, ls_init=1e-5):
    """PyTorch-shaped (unpadded) parameters."""
    keys = iter(jax.random.split(key, 32))

    def nrm(shape, std=0.02):
        return (std * jax.random.normal(next(keys), shape)).astype(jnp.float32)

    d0, d1 = embed_dims
    params = {
        "pe_w": nrm((d0, 3, in_patch, in_patch)),
        "pe_b": jnp.zeros((d0,), jnp.float32),
        "down_w": nrm((d1, d0, down_patch, down_patch)),
        "down_b": jnp.zeros((d1,), jnp.float32),
        "norm_g": jnp.ones((d1,), jnp.float32),
        "norm_b": jnp.zeros((d1,), jnp.float32),
        "head_w": nrm((d1, num_classes)),
        "head_b": jnp.zeros((num_classes,), jnp.float32),
        "blocks": [],
    }
    for dim, mr in zip(embed_dims, mlp_ratios):
        hd = int(mr * dim)
        params["blocks"].append(dict(
            g1=jnp.ones((dim,), jnp.float32), b1=jnp.zeros((dim,), jnp.float32),
            g2=jnp.ones((dim,), jnp.float32), b2=jnp.zeros((dim,), jnp.float32),
            ls1=jnp.full((dim,), ls_init, jnp.float32),
            ls2=jnp.full((dim,), ls_init, jnp.float32),
            w1=nrm((dim, hd)), bf1=jnp.zeros((hd,), jnp.float32),
            w2=nrm((hd, dim)), bf2=jnp.zeros((dim,), jnp.float32),
        ))
    return params


def prepare_params(p):
    """Pad channel/class/K dims to 128 lanes, reshape conv weights to matmul form,
    cast MXU weights to bf16 (accumulation stays f32 inside the kernels)."""
    out = {}
    # stem: [d0, 3, kh, kw] -> [round_up(kh*kw*3,128), 128] bf16
    w = p["pe_w"]
    d0, cin, kh, kw = w.shape
    wmat = w.transpose(2, 3, 1, 0).reshape(kh * kw * cin, d0)
    kp = _round_up(kh * kw * cin, 128)
    wmat = jnp.pad(wmat, ((0, kp - kh * kw * cin), (0, CPAD - d0)))
    out["pe_wmat"] = wmat.astype(jnp.bfloat16)
    out["pe_b"] = jnp.pad(p["pe_b"], ((0, CPAD - d0),)).reshape(1, CPAD)
    # downsample: [d1, d0, kh, kw] -> [kh*kw*CPAD, CPAD] bf16 (input channels padded)
    w = p["down_w"]
    d1, d0_, kh2, kw2 = w.shape
    wmat = jnp.pad(w.transpose(2, 3, 1, 0),
                   ((0, 0), (0, 0), (0, CPAD - d0_), (0, CPAD - d1)))
    out["down_wmat"] = wmat.reshape(kh2 * kw2 * CPAD, CPAD).astype(jnp.bfloat16)
    out["down_b"] = jnp.pad(p["down_b"], ((0, CPAD - d1),)).reshape(1, CPAD)
    # blocks
    out["blocks"] = []
    for blk in p["blocks"]:
        dim = int(blk["g1"].shape[0])
        hd = int(blk["w1"].shape[1])
        hdp = _round_up(hd, 128)

        def pc(v):
            return jnp.pad(v, ((0, CPAD - dim),)).reshape(1, 1, CPAD)

        out["blocks"].append(dict(
            c_true=dim,
            g1=pc(blk["g1"]), ls1=pc(blk["ls1"]),
            g2=pc(blk["g2"]), b2=pc(blk["b2"]),
            # b1 (beta1) cancels analytically in pool(norm1(x)) - norm1(x); unused.
            ls2=jnp.pad(blk["ls2"], ((0, CPAD - dim),)).reshape(1, CPAD),
            w1=jnp.pad(blk["w1"], ((0, CPAD - dim), (0, hdp - hd))).astype(jnp.bfloat16),
            bf1=jnp.pad(blk["bf1"], ((0, hdp - hd),)).reshape(1, hdp),
            w2=jnp.pad(blk["w2"], ((0, hdp - hd), (0, CPAD - dim))).astype(jnp.bfloat16),
            bf2=jnp.pad(blk["bf2"], ((0, CPAD - dim),)).reshape(1, CPAD),
        ))
    # head
    d_last = int(p["norm_g"].shape[0])
    nc = int(p["head_b"].shape[0])
    ncp = _round_up(nc, 128)
    out["c_last"] = d_last
    out["num_classes"] = nc
    out["norm_g"] = jnp.pad(p["norm_g"], ((0, CPAD - d_last),)).reshape(1, CPAD)
    out["norm_b"] = jnp.pad(p["norm_b"], ((0, CPAD - d_last),)).reshape(1, CPAD)
    out["head_w"] = jnp.pad(p["head_w"],
                            ((0, CPAD - d_last), (0, ncp - nc))).astype(jnp.bfloat16)
    out["head_b"] = jnp.pad(p["head_b"], ((0, ncp - nc),)).reshape(1, ncp)
    return out


def run_block(feat, blk, pool_size):
    """One PoolFormerBlock on a [B, H, W, CPAD] bf16 feature map."""
    b, h, w, c = feat.shape
    inv = pool_inv_counts(h, w, pool_size)
    x2, sc, sh = pool_mixer(feat, inv, blk, pool_size)
    x3 = ffn_block(x2.reshape(b, h * w, c), sc, sh, blk)
    return x3.reshape(b, h, w, c)


def poolformer_forward(x_nchw, pp, pool_size=3):
    """x: [B, 3, H, W] NCHW -> logits [B, num_classes]."""
    x = jnp.transpose(x_nchw, (0, 2, 3, 1)).astype(jnp.bfloat16)  # NHWC, bf16 activations
    # stem PatchEmbed: Conv2d(3, D0, k=7, s=4, p=2), no norm
    feat, h, w = patch_embed_conv(x, pp["pe_wmat"], pp["pe_b"], 7, 7, 4, 2)
    # stage 0: one PoolFormerBlock(dim=D0)
    feat = run_block(feat, pp["blocks"][0], pool_size)
    # downsample PatchEmbed: Conv2d(D0, D1, k=3, s=2, p=1)
    feat, h, w = patch_embed_conv(feat, pp["down_wmat"], pp["down_b"], 3, 3, 2, 1)
    # stage 1: one PoolFormerBlock(dim=D1)
    feat = run_block(feat, pp["blocks"][1], pool_size)
    # final GroupNorm + global average pool + Linear head
    b, hh, ww, c = feat.shape
    return head(feat.reshape(b, hh * ww, c), pp)


if __name__ == "__main__":
    key = jax.random.PRNGKey(0)
    kx, kp = jax.random.split(key)
    # Small PoolFormer: layers=[1,1], embed_dims=[8,16], mlp_ratios=[4,4], classes=10
    x = jax.random.normal(kx, (2, 3, 32, 32), jnp.float32)
    params = init_params(kp, embed_dims=(8, 16), mlp_ratios=(4, 4), num_classes=10)
    pp = prepare_params(params)

    out = poolformer_forward(x, pp)
    out = jax.block_until_ready(out)
    assert out.shape == (2, 10) and bool(jnp.all(jnp.isfinite(out)))
    print("KERNEL_OK")
</pallas_src>

<mosaic_0001>
module attributes {stable_mosaic.version = 11 : i64} {
  func.func @kernel(%arg0: i32, %arg1: memref<128x256xbf16, #tpu.memory_space<vmem>>, %arg2: memref<256x128xbf16, #tpu.memory_space<vmem>>, %arg3: memref<1x128xf32, #tpu.memory_space<vmem>>, %arg4: memref<128x128xbf16, #tpu.memory_space<vmem>>) attributes {dimension_semantics = [#tpu.dimension_semantics<parallel>], iteration_bounds = array<i64: 1>, scalar_prefetch = 0 : i64, scratch_operands = 0 : i64, tpu.core_type = #tpu.core_type<tc>, window_params = [{transform_indices = @transform_0, window_bounds = array<i64: 128, 256>}, {pipeline_mode = #tpu.pipeline_mode<synchronous>, transform_indices = @transform_1, window_bounds = array<i64: 256, 128>}, {pipeline_mode = #tpu.pipeline_mode<synchronous>, transform_indices = @transform_2, window_bounds = array<i64: 1, 128>}, {transform_indices = @transform_3, window_bounds = array<i64: 128, 128>}]} {
    %c0 = arith.constant 0 : index
    %c0_0 = arith.constant 0 : index
    %0 = vector.load %arg1[%c0, %c0_0] : memref<128x256xbf16, #tpu.memory_space<vmem>>, vector<128x256xbf16>
    %c0_1 = arith.constant 0 : index
    %c0_2 = arith.constant 0 : index
    %1 = vector.load %arg2[%c0_1, %c0_2] : memref<256x128xbf16, #tpu.memory_space<vmem>>, vector<256x128xbf16>
    %cst = arith.constant dense<0.000000e+00> : vector<128x128xf32>
    %2 = tpu.matmul %0, %1, %cst {dimension_numbers = #tpu.dot_dimension_numbers<[1], [0], [0], [1], [0, 0, 1, 1], [], []>} : vector<128x256xbf16>, vector<256x128xbf16>, vector<128x128xf32> -> vector<128x128xf32>
    %c0_3 = arith.constant 0 : index
    %c0_4 = arith.constant 0 : index
    %3 = vector.load %arg3[%c0_3, %c0_4] : memref<1x128xf32, #tpu.memory_space<vmem>>, vector<1x128xf32>
    %4 = vector.broadcast %3 : vector<1x128xf32> to vector<128x128xf32>
    %5 = arith.addf %2, %4 : vector<128x128xf32>
    %6 = arith.truncf %5 : vector<128x128xf32> to vector<128x128xbf16>
    %c0_5 = arith.constant 0 : index
    %c0_6 = arith.constant 0 : index
    %7 = vector.load %arg4[%c0_5, %c0_6] : memref<128x128xbf16, #tpu.memory_space<vmem>>, vector<128x128xbf16>
    tpu.vector_store %arg4[%c0_5, %c0_6], %6 {strides = array<i32>} : memref<128x128xbf16, #tpu.memory_space<vmem>>, vector<128x128xbf16>,
    return
  }
  func.func @transform_0(%arg0: i32) -> (i32, i32) {
    %c0_i32 = arith.constant 0 : i32
    %c0_i32_0 = arith.constant 0 : i32
    return %arg0, %c0_i32 : i32, i32
  }
  func.func @transform_1(%arg0: i32) -> (i32, i32) {
    %c0_i32 = arith.constant 0 : i32
    %c0_i32_0 = arith.constant 0 : i32
    %c0_i32_1 = arith.constant 0 : i32
    return %c0_i32, %c0_i32_0 : i32, i32
  }
  func.func @transform_2(%arg0: i32) -> (i32, i32) {
    %c0_i32 = arith.constant 0 : i32
    %c0_i32_0 = arith.constant 0 : i32
    %c0_i32_1 = arith.constant 0 : i32
    return %c0_i32, %c0_i32_0 : i32, i32
  }
  func.func @transform_3(%arg0: i32) -> (i32, i32) {
    %c0_i32 = arith.constant 0 : i32
    %c0_i32_0 = arith.constant 0 : i32
    return %arg0, %c0_i32 : i32, i32
  }
}

</mosaic_0001>

<bundles_post_ra>
// kernel: tpu_custom_call.1
= control target key start
LH: loop header
LB: loop body
LE: loop exit
PB: predicated region body
PF: predicated region fallthrough
CT: control target
= control target key end

     0   :  { %8 = vsyncpa [#allocation3], 0  ;;  %s838_s0 = inlined_call_operand.hbm [shape: bf16[128,256], index: 0, kind: input, shape index: {}]   ;;  %s839_s1 = inlined_call_operand.hbm [shape: bf16[256,128], index: 1, kind: input, shape index: {}]   ;;  %s840_s2 = inlined_call_operand.vmem [shape: f32[1,128], index: 2, kind: input, shape index: {}]   ;;  %s841_s3 = inlined_call_operand.hbm [shape: bf16[128,128], index: 3, kind: output, shape index: {}]  }
   0x1   :  { %9 = vsyncpa [#allocation6], 0 }
   0x2   :  { %10 = vsyncpa [#allocation4], 0  ;;  %s775_s12 = smov [#allocation2]  }
   0x3   :  { %s16_s13 = sshll.u32 %s775_s12, 4  ;;  %s17_s13 = int_to_ptr.vmem [resolvable:$true] %s16_s13 }
   0x4   :  { %s717_s14 = scalar_lea.vmem %s17_s13, 2048  ;;  %p722_p1 = scmp.lt.s32.totalorder %s17_s13, %s17_s13 }
   0x5   :  { %p718_p0 = scmp.ne.s32.totalorder %s17_s13, %s717_s14  ;;  %p723_p2 = scmp.lt.s32.totalorder %s717_s14, %s717_s14 }
   0x7   :  { %p724_p3 = por %p723_p2, %p722_p1 }
   0x9   :  { %p725_p4 = pnand %p724_p3, %p718_p0 }
   0xb   :  { %728 = shalt.err (!%p725_p4)
}
   0xc   :  { %s776_s15 = smov 128   ;;  %s777_s16 = smov 8  }
   0xd   :  { %22 = dma.hbm_to_vmem [thread:$0]  %s838_s0, 2048, %s17_s13, [#allocation3], %s776_s15, %s776_s15, %s777_s16  }
   0xe   :  { %s778_s19 = smov [#allocation5]  }
   0xf   :  { %s28_s20 = sshll.u32 %s778_s19, 4  ;;  %s29_s20 = int_to_ptr.vmem [resolvable:$true] %s28_s20 }
  0x10   :  { %s737_s21 = scalar_lea.vmem %s29_s20, 2048  ;;  %p742_p6 = scmp.lt.s32.totalorder %s29_s20, %s29_s20 }
  0x11   :  { %p738_p5 = scmp.ne.s32.totalorder %s29_s20, %s737_s21  ;;  %p743_p7 = scmp.lt.s32.totalorder %s737_s21, %s737_s21 }
  0x13   :  { %p744_p8 = por %p743_p7, %p742_p6 }
  0x15   :  { %p745_p9 = pnand %p744_p8, %p738_p5 }
  0x17   :  { %748 = shalt.err (!%p745_p9)
}
  0x18   :  { %s779_s22 = smov 64   ;;  %s780_s23 = smov 4  }
  0x19   :  { %34 = dma.hbm_to_vmem [thread:$0]  %s839_s1, 2048, %s29_s20, [#allocation6], %s779_s22, %s779_s22, %s780_s23  }
  0x1a   :  { %769 = dma.done.wait [#allocation3], 2048  }
  0x1b   :  { %770 = vsyncadd [#allocation3], 4294965248 }
  0x1c   :  { %771 = dma.done.wait [#allocation6], 2048  }
  0x1d   :  { %772 = vsyncadd [#allocation6], 4294965248  ;;  %v669_v0 = vld [vmem:[#allocation5 + $0x78] sm:$0xff]   ;;  %v671_v2 = vld [vmem:[#allocation5 + $0x70] sm:$0xff]  }
  0x1e   :  { %v670_v1 = vld [vmem:[#allocation5 + $0x38] sm:$0xff]   ;;  %582 = vmatprep.subr.bf16.mxu0 %v669_v0  ;;  %646 = vmatprep.subr.bf16.mxu1 %v669_v0  ;;  %v672_v3 = vld [vmem:[#allocation5 + $0x30] sm:$0xff]   ;;  %v673_v4 = vld [vmem:[#allocation5 + $0x68] sm:$0xff]  }
  0x1f   :  { %583 = vmatpush3.bf16.msra.mxu0 %v670_v1  ;;  %654 = vmatpush3.bf16.msra.mxu1 %v670_v1  ;;  %v674_v5 = vld [vmem:[#allocation5 + $0x28] sm:$0xff]   ;;  %v675_v6 = vld [vmem:[#allocation5 + $0x60] sm:$0xff]   ;;  %v677_v8 = vld [vmem:[#allocation5 + $0x58] sm:$0xff]  }
  0x20   :  { %584 = vmatprep.subr.bf16.mxu0 %v671_v2  ;;  %647 = vmatprep.subr.bf16.mxu1 %v671_v2  ;;  %v676_v7 = vld [vmem:[#allocation5 + $0x20] sm:$0xff]   ;;  %v678_v9 = vld [vmem:[#allocation5 + $0x18] sm:$0xff]   ;;  %v679_v10 = vld [vmem:[#allocation5 + $0x50] sm:$0xff]  }
  0x21   :  { %v687_v11 = vld [vmem:[#allocation2 + $0x4] ss:$8 sps:$4 sm:$0xff]   ;;  %v680_v13 = vld [vmem:[#allocation5 + $0x10] sm:$0xff]   ;;  %v685_v18 = vld [vmem:[#allocation2] ss:$8 sps:$4 sm:$0xff]  }
  0x22   :  { %v690_v12 = vld [vmem:[#allocation2 + $0x44] ss:$8 sps:$4 sm:$0xff]   ;;  %307 = vmatprep.mubr.bf16.mxu0 %v687_v11  ;;  %v688_v19 = vld [vmem:[#allocation2 + $0x40] ss:$8 sps:$4 sm:$0xff]   ;;  %v691_v20 = vld [vmem:[#allocation2 + $0x14] ss:$8 sps:$4 sm:$0xff]  }
  0x23   :  { %585 = vmatpush3.bf16.msra.mxu0 %v672_v3  ;;  %655 = vmatpush3.bf16.msra.mxu1 %v672_v3  ;;  %v681_v14 = vld [vmem:[#allocation5 + $0x48] sm:$0xff]   ;;  %v683_v16 = vld [vmem:[#allocation5 + $0x40] sm:$0xff]   ;;  %v693_v21 = vld [vmem:[#allocation2 + $0x54] ss:$8 sps:$4 sm:$0xff]  }
  0x24   :  { %586 = vmatprep.subr.bf16.mxu0 %v673_v4  ;;  %648 = vmatprep.subr.bf16.mxu1 %v673_v4  ;;  %v682_v15 = vld [vmem:[#allocation5 + $0x8] sm:$0xff]   ;;  %v684_v17 = vld [vmem:[#allocation5] sm:$0xff]   ;;  %v695_v22 = vld [vmem:[#allocation2 + $0x10] ss:$8 sps:$4 sm:$0xff]  }
  0x25   :  { %339 = vmatprep.mubr.bf16.mxu1 %v690_v12  ;;  %v696_v23 = vld [vmem:[#allocation2 + $0x50] ss:$8 sps:$4 sm:$0xff]   ;;  %v697_v24 = vld [vmem:[#allocation2 + $0x24] ss:$8 sps:$4 sm:$0xff]   ;;  %v701_v26 = vld [vmem:[#allocation2 + $0x20] ss:$8 sps:$4 sm:$0xff]  }
  0x26   :  { %v699_v25 = vld [vmem:[#allocation2 + $0x64] ss:$8 sps:$4 sm:$0xff]   ;;  %v702_v27 = vld [vmem:[#allocation2 + $0x60] ss:$8 sps:$4 sm:$0xff]   ;;  %v703_v28 = vld [vmem:[#allocation2 + $0x34] ss:$8 sps:$4 sm:$0xff]  }
  0x27   :  { %587 = vmatpush3.bf16.msra.mxu0 %v674_v5  ;;  %656 = vmatpush3.bf16.msra.mxu1 %v674_v5  ;;  %v705_v29 = vld [vmem:[#allocation2 + $0x74] ss:$8 sps:$4 sm:$0xff]   ;;  %v707_v30 = vld [vmem:[#allocation2 + $0x30] ss:$8 sps:$4 sm:$0xff]   ;;  %v814_v40 = vld [vmem:[%s840_s2] ss:$0 sm:$0xff] }
  0x28   :  { %588 = vmatprep.subr.bf16.mxu0 %v675_v6  ;;  %649 = vmatprep.subr.bf16.mxu1 %v675_v6  ;;  %v708_v31 = vld [vmem:[#allocation2 + $0x70] ss:$8 sps:$4 sm:$0xff]   ;;  %s781_s2 = smov [#allocation7]  }
  0x29   :  { %s457_s26 = sshll.u32 %s781_s2, 4  ;;  %s458_s26 = int_to_ptr.vmem [resolvable:$true] %s457_s26 }
  0x2a   :  { %s749_s27 = scalar_lea.vmem %s458_s26, 1024  ;;  %p754_p11 = scmp.lt.s32.totalorder %s458_s26, %s458_s26 }
  0x2b   :  { %589 = vmatpush3.bf16.msra.mxu0 %v676_v7  ;;  %657 = vmatpush3.bf16.msra.mxu1 %v676_v7  ;;  %p750_p10 = scmp.ne.s32.totalorder %s458_s26, %s749_s27  ;;  %p755_p12 = scmp.lt.s32.totalorder %s749_s27, %s749_s27 }
  0x2c   :  { %590 = vmatprep.subr.bf16.mxu0 %v677_v8  ;;  %650 = vmatprep.subr.bf16.mxu1 %v677_v8 }
  0x2d   :  { %p756_p13 = por %p755_p12, %p754_p11 }
  0x2f   :  { %591 = vmatpush3.bf16.msra.mxu0 %v678_v9  ;;  %658 = vmatpush3.bf16.msra.mxu1 %v678_v9  ;;  %p757_p0 = pnand %p756_p13, %p750_p10 }
  0x30   :  { %592 = vmatprep.subr.bf16.mxu0 %v679_v10  ;;  %651 = vmatprep.subr.bf16.mxu1 %v679_v10 }
  0x33   :  { %593 = vmatpush3.bf16.msra.mxu0 %v680_v13  ;;  %659 = vmatpush3.bf16.msra.mxu1 %v680_v13 }
  0x34   :  { %594 = vmatprep.subr.bf16.mxu0 %v681_v14  ;;  %652 = vmatprep.subr.bf16.mxu1 %v681_v14 }
  0x37   :  { %595 = vmatpush3.bf16.msra.mxu0 %v682_v15  ;;  %660 = vmatpush3.bf16.msra.mxu1 %v682_v15 }
  0x38   :  { %596 = vmatprep.subr.bf16.mxu0 %v683_v16  ;;  %653 = vmatprep.subr.bf16.mxu1 %v683_v16 }
  0x3b   :  { %597 = vmatpush3.bf16.msra.mxu0 %v684_v17  ;;  %661 = vmatpush3.bf16.msra.mxu1 %v684_v17 }
  0x3e   :  { %308 = vmatmul.mubr.bf16.vlgmr.msra.gmra.mxu0 %v685_v18  ;;  %340 = vmatmul.mubr.bf16.vlgmr.msra.gmra.mxu1 %v688_v19 }
  0x3f   :  { %315 = vmatprep.mubr.bf16.mxu0 %v691_v20  ;;  %347 = vmatprep.mubr.bf16.mxu1 %v693_v21 }
  0x46   :  { %316 = vmatmul.mubr.bf16.gmra.mxu0 %v695_v22  ;;  %348 = vmatmul.mubr.bf16.gmra.mxu1 %v696_v23 }
  0x47   :  { %323 = vmatprep.mubr.bf16.mxu0 %v697_v24  ;;  %355 = vmatprep.mubr.bf16.mxu1 %v699_v25 }
  0x4e   :  { %324 = vmatmul.mubr.bf16.gmra.mxu0 %v701_v26  ;;  %356 = vmatmul.mubr.bf16.gmra.mxu1 %v702_v27 }
  0x4f   :  { %331 = vmatprep.mubr.bf16.mxu0 %v703_v28  ;;  %363 = vmatprep.mubr.bf16.mxu1 %v705_v29 }
  0x56   :  { %332 = vmatmul.mubr.bf16.gmra.mxu0 %v707_v30  ;;  %364 = vmatmul.mubr.bf16.gmra.mxu1 %v708_v31 }
  0xfe   :  { %v598_v32 = vpop.f32.mrf.mxu0  ;;  %v622_v33 = vpop.f32.mrf.mxu1 }
 0x100   :  { %v599_v34 = vpop.f32.mrf.mxu0  ;;  %v623_v35 = vpop.f32.mrf.mxu1 }
 0x101   :  { %v600_v38 = vadd.f32 %v599_v34, %v598_v32  ;;  %v624_v39 = vadd.f32 %v623_v35, %v622_v33 }
 0x102   :  { %v601_v36 = vpop.f32.mrf.mxu0  ;;  %v625_v37 = vpop.f32.mrf.mxu1 }
 0x103   :  { %v310_v47 = vadd.f32 %v600_v38, %v814_v40  ;;  %v342_v48 = vadd.f32 %v624_v39, %v814_v40 }
 0x104   :  { %v602_v41 = vpop.f32.mrf.mxu0  ;;  %v626_v42 = vpop.f32.mrf.mxu1 }
 0x105   :  { %v603_v43 = vadd.f32 %v602_v41, %v601_v36  ;;  %v627_v44 = vadd.f32 %v626_v42, %v625_v37 }
 0x106   :  { %v604_v45 = vpop.f32.mrf.mxu0  ;;  %v628_v46 = vpop.f32.mrf.mxu1 }
 0x107   :  { %v313_v49 = vadd.f32 %v603_v43, %v814_v40  ;;  %v345_v50 = vadd.f32 %v627_v44, %v814_v40 }
 0x108   :  { %v605_v51 = vpop.f32.mrf.mxu0  ;;  %v629_v52 = vpop.f32.mrf.mxu1 }
 0x109   :  { %v538_v53 = vpack.c.bf16 %v313_v49, %v310_v47  ;;  %v558_v54 = vpack.c.bf16 %v345_v50, %v342_v48  ;;  %v606_v57 = vadd.f32 %v605_v51, %v604_v45  ;;  %v630_v58 = vadd.f32 %v629_v52, %v628_v46 }
 0x10a   :  { %v607_v55 = vpop.f32.mrf.mxu0  ;;  %v631_v56 = vpop.f32.mrf.mxu1 }
 0x10b   :  { %539 = vst [vmem:[#allocation7] sm:$0xff] %v538_v53   ;;  %578 = vst [vmem:[#allocation7 + $0x20] sm:$0xff] %v558_v54   ;;  %v318_v1 = vadd.f32 %v606_v57, %v814_v40  ;;  %v350_v2 = vadd.f32 %v630_v58, %v814_v40 }
 0x10c   :  { %v608_v59 = vpop.f32.mrf.mxu0  ;;  %v632_v60 = vpop.f32.mrf.mxu1 }
 0x10d   :  { %v609_v61 = vadd.f32 %v608_v59, %v607_v55  ;;  %v633_v62 = vadd.f32 %v632_v60, %v631_v56 }
 0x10e   :  { %v610_v63 = vpop.f32.mrf.mxu0  ;;  %v634_v0 = vpop.f32.mrf.mxu1 }
 0x10f   :  { %v321_v3 = vadd.f32 %v609_v61, %v814_v40  ;;  %v353_v4 = vadd.f32 %v633_v62, %v814_v40 }
 0x110   :  { %v611_v5 = vpop.f32.mrf.mxu0  ;;  %v635_v6 = vpop.f32.mrf.mxu1 }
 0x111   :  { %v543_v7 = vpack.c.bf16 %v321_v3, %v318_v1  ;;  %v563_v8 = vpack.c.bf16 %v353_v4, %v350_v2  ;;  %v612_v11 = vadd.f32 %v611_v5, %v610_v63  ;;  %v636_v12 = vadd.f32 %v635_v6, %v634_v0 }
 0x112   :  { %v613_v9 = vpop.f32.mrf.mxu0  ;;  %v637_v10 = vpop.f32.mrf.mxu1 }
 0x113   :  { %575 = vst [vmem:[#allocation7 + $0x8] sm:$0xff] %v543_v7   ;;  %579 = vst [vmem:[#allocation7 + $0x28] sm:$0xff] %v563_v8   ;;  %v326_v19 = vadd.f32 %v612_v11, %v814_v40  ;;  %v358_v20 = vadd.f32 %v636_v12, %v814_v40 }
 0x114   :  { %v614_v13 = vpop.f32.mrf.mxu0  ;;  %v638_v14 = vpop.f32.mrf.mxu1 }
 0x115   :  { %v615_v15 = vadd.f32 %v614_v13, %v613_v9  ;;  %v639_v16 = vadd.f32 %v638_v14, %v637_v10 }
 0x116   :  { %v616_v17 = vpop.f32.mrf.mxu0  ;;  %v640_v18 = vpop.f32.mrf.mxu1 }
 0x117   :  { %v329_v21 = vadd.f32 %v615_v15, %v814_v40  ;;  %v361_v22 = vadd.f32 %v639_v16, %v814_v40 }
 0x118   :  { %v617_v23 = vpop.f32.mrf.mxu0  ;;  %v641_v24 = vpop.f32.mrf.mxu1 }
 0x119   :  { %v548_v25 = vpack.c.bf16 %v329_v21, %v326_v19  ;;  %v568_v26 = vpack.c.bf16 %v361_v22, %v358_v20  ;;  %v618_v29 = vadd.f32 %v617_v23, %v616_v17  ;;  %v642_v30 = vadd.f32 %v641_v24, %v640_v18 }
 0x11a   :  { %v619_v27 = vpop.f32.mrf.mxu0  ;;  %v643_v28 = vpop.f32.mrf.mxu1 }
 0x11b   :  { %576 = vst [vmem:[#allocation7 + $0x10] sm:$0xff] %v548_v25   ;;  %580 = vst [vmem:[#allocation7 + $0x30] sm:$0xff] %v568_v26   ;;  %v334_v35 = vadd.f32 %v618_v29, %v814_v40  ;;  %v366_v36 = vadd.f32 %v642_v30, %v814_v40 }
 0x11c   :  { %v620_v31 = vpop.f32.mrf.mxu0  ;;  %v644_v32 = vpop.f32.mrf.mxu1 }
 0x11d   :  { %v621_v33 = vadd.f32 %v620_v31, %v619_v27  ;;  %v645_v34 = vadd.f32 %v644_v32, %v643_v28 }
 0x11f   :  { %v337_v37 = vadd.f32 %v621_v33, %v814_v40  ;;  %v369_v38 = vadd.f32 %v645_v34, %v814_v40 }
 0x121   :  { %v553_v39 = vpack.c.bf16 %v337_v37, %v334_v35  ;;  %v573_v41 = vpack.c.bf16 %v369_v38, %v366_v36 }
 0x123   :  { %577 = vst [vmem:[#allocation7 + $0x18] sm:$0xff] %v553_v39   ;;  %581 = vst [vmem:[#allocation7 + $0x38] sm:$0xff] %v573_v41  }
 0x124   :  { %760 = shalt.err (!%p757_p0)
}
 0x125   :  { %463 = dma.vmem_to_hbm [thread:$0]  %s458_s26, 1024, %s841_s3, [#allocation4], %s779_s22, %s779_s22, %s780_s23  }
 0x126   :  { %773 = dma.done.wait [#allocation4], 1024  }
 0x127   :  { %774 = vsyncadd [#allocation4], 4294966272 }
 0x128   :  { %467 = vsyncpa [#allocation3], 1 }
 0x129   :  { %468 = vsyncpa [#allocation6], 1 }
 0x12a   :  { %469 = vsyncpa [#allocation4], 1 }

</bundles_post_ra>
